<compile_context>
chip_gen: v7x
topology: tpu7x:2x2x1
jax: 0.10.0
libtpu: 0.0.40
codegen_flags: <defaults>
</compile_context>

<pallas_src>
import jax
import jax.numpy as jnp
from jax import lax
from jax.experimental import pallas as pl
from jax.experimental.pallas import tpu as pltpu

_LANE = 128


def _round_up(n, m):
    return ((n + m - 1) // m) * m


def _default_bf16_epilogue():
    """bf16 VPU exists on v6e / v7x; keep the epilogue in f32 on older chips."""
    try:
        kind = jax.devices()[0].device_kind.lower()
    except Exception:
        return False
    return not any(tag in kind for tag in ("v2", "v3", "v4", "v5"))


def _make_kernel(bf16_epilogue):
    def lr_mlp_kernel(x_ref,
                      w1_ref, b1_ref,
                      w2_ref, b2_ref,
                      w3_ref, b3_ref,
                      w4_ref, b4_ref,
                      w5_ref, b5_ref,
                      o_ref):
        def layer(h, w_ref, b_ref):
            acc = jnp.dot(h, w_ref[...], preferred_element_type=jnp.float32)
            if bf16_epilogue:
                # v6e/v7x: bias add + ReLU in packed bf16 (halves VALU work).
                return jnp.maximum(acc.astype(jnp.bfloat16) + b_ref[...], 0.0)
            # v5e and older: no bf16 VPU -> keep the epilogue in f32.
            return jnp.maximum(acc + b_ref[...], 0.0).astype(jnp.bfloat16)

        h = layer(x_ref[...], w1_ref, b1_ref)      # (tb, 128) bf16
        h = layer(h, w2_ref, b2_ref)               # (tb, 256)
        h = layer(h, w3_ref, b3_ref)               # (tb, 256)
        h = layer(h, w4_ref, b4_ref)               # (tb, 256)

        # Layer 5 (256 -> 1): contract w5 (1,256) against h (tb,256) on the MXU
        # so the per-row scalar ends up on the lane axis -> lane-dense stores
        # (tb/128 dense vst instead of tb/8 masked single-lane ones).
        row = lax.dot_general(
            w5_ref[...], h,
            dimension_numbers=(((1,), (1,)), ((), ())),
            preferred_element_type=jnp.float32)           # (1, tb) f32
        o_ref[0] = row + b5_ref[...]                      # (1,1) bias broadcast

    return lr_mlp_kernel


def init_params(key):
    """Deterministic init matching nn.Linear shapes: 5->128->256->256->256->1."""
    dims = [(5, 128), (128, 256), (256, 256), (256, 256), (256, 1)]
    params = []
    for fan_in, fan_out in dims:
        kw, kb, key = jax.random.split(key, 3)
        bound = 1.0 / jnp.sqrt(fan_in)
        w = jax.random.uniform(kw, (fan_in, fan_out), jnp.float32, -bound, bound)
        b = jax.random.uniform(kb, (1, fan_out), jnp.float32, -bound, bound)
        params.append((w, b))
    return params


def prepare_params(params, bf16_epilogue=None):
    """One-time weight prep (pad/cast/reshape) hoisted out of the forward pass."""
    if bf16_epilogue is None:
        bf16_epilogue = _default_bf16_epilogue()
    epi = jnp.bfloat16 if bf16_epilogue else jnp.float32
    (w1, b1), (w2, b2), (w3, b3), (w4, b4), (w5, b5) = params
    # Pad K: 5 -> 8 with zero rows (inert) so layer 1 stays sublane-aligned.
    w1_p = jnp.zeros((8, 128), jnp.bfloat16).at[:5, :].set(w1.astype(jnp.bfloat16))
    tensors = (
        w1_p, b1.reshape(1, 128).astype(epi),
        w2.astype(jnp.bfloat16), b2.reshape(1, 256).astype(epi),
        w3.astype(jnp.bfloat16), b3.reshape(1, 256).astype(epi),
        w4.astype(jnp.bfloat16), b4.reshape(1, 256).astype(epi),
        w5.astype(jnp.bfloat16).reshape(1, 256),
        b5.reshape(1, 1).astype(jnp.float32),
    )
    return {"bf16_epilogue": bool(bf16_epilogue), "tensors": tensors}


def lr_forward(x, prepared, tile_b=2048):
    B, F = x.shape
    assert F == 5
    bf16_epilogue = prepared["bf16_epilogue"]
    tensors = prepared["tensors"]

    # Tile the batch: lane-aligned tiles, and prefer >= 2 grid steps so both
    # v7x TensorCores get work under dimension_semantics=("parallel",).
    bp_min = _round_up(B, _LANE)
    n_steps = max(1, -(-bp_min // max(int(tile_b), _LANE)))
    if bp_min >= 2 * _LANE:
        n_steps = max(n_steps, 2)
    tb = _round_up(-(-bp_min // n_steps), _LANE)
    Bp = tb * n_steps

    # Pad features 5 -> 8 (zero columns are inert against w1's zero rows), cast
    # to bf16 and pad the batch to a tile multiple.
    # TODO(synk): fold this pad/cast into the kernel (needs a K=5 matmul or an
    # in-kernel lane concat); kept in the wrapper for lowering robustness.
    x_p = jnp.zeros((Bp, 8), jnp.bfloat16).at[:B, :5].set(x.astype(jnp.bfloat16))

    def resident(shape):
        # Constant block index -> fetched once, stays VMEM-resident across steps.
        return pl.BlockSpec(shape, lambda i: tuple(0 for _ in shape))

    in_specs = [
        pl.BlockSpec((tb, 8), lambda i: (i, 0)),          # x tile
        resident((8, 128)), resident((1, 128)),           # w1, b1
        resident((128, 256)), resident((1, 256)),         # w2, b2
        resident((256, 256)), resident((1, 256)),         # w3, b3
        resident((256, 256)), resident((1, 256)),         # w4, b4
        resident((1, 256)), resident((1, 1)),             # w5 (row), b5
    ]
    out_spec = pl.BlockSpec((1, 1, tb), lambda i: (i, 0, 0))

    weight_elems = 8 * 128 + 128 * 256 + 2 * 256 * 256 + 256
    bias_elems = 128 + 3 * 256 + 1
    flops = 2 * Bp * (8 * 128 + 128 * 256 + 256 * 256 + 256 * 256 + 256)
    bytes_accessed = (x_p.size * 2 + weight_elems * 2
                      + bias_elems * (2 if bf16_epilogue else 4) + Bp * 4)

    out3 = pl.pallas_call(
        _make_kernel(bf16_epilogue),
        out_shape=jax.ShapeDtypeStruct((n_steps, 1, tb), jnp.float32),
        grid_spec=pltpu.PrefetchScalarGridSpec(
            num_scalar_prefetch=0,
            grid=(n_steps,),
            in_specs=in_specs,
            out_specs=out_spec,
        ),
        compiler_params=pltpu.CompilerParams(
            dimension_semantics=("parallel",),
            vmem_limit_bytes=32 * 1024 * 1024,
        ),
        cost_estimate=pl.CostEstimate(
            flops=flops, transcendentals=0, bytes_accessed=bytes_accessed),
    )(x_p, *tensors)

    # (n_steps, 1, tb) lane-major slab -> (B, 1) column.
    return out3.reshape(Bp, 1)[:B]


def reference_forward(x, params, bf16_epilogue):
    """Pure-JAX reference mirroring the kernel's bf16-weight / f32-accum math."""
    (w1, b1), (w2, b2), (w3, b3), (w4, b4), (w5, b5) = params
    h = x.astype(jnp.bfloat16)
    for (w, b) in ((w1, b1), (w2, b2), (w3, b3), (w4, b4)):
        acc = jnp.dot(h, w.astype(jnp.bfloat16), preferred_element_type=jnp.float32)
        if bf16_epilogue:
            h = jnp.maximum(acc.astype(jnp.bfloat16) + b.astype(jnp.bfloat16), 0.0)
        else:
            h = jnp.maximum(acc + b, 0.0).astype(jnp.bfloat16)
    return jnp.dot(h, w5.astype(jnp.bfloat16),
                   preferred_element_type=jnp.float32) + b5


if __name__ == "__main__":
    key = jax.random.PRNGKey(0)
    kx, kp = jax.random.split(key)
    params = init_params(kp)
    prep = prepare_params(params)

    # Small check: single grid step (tb = 128).
    x1 = jax.random.normal(kx, (8, 5), dtype=jnp.float32)
    out1 = jax.block_until_ready(lr_forward(x1, prep))
    ref1 = reference_forward(x1, params, prep["bf16_epilogue"])
    assert out1.shape == (8, 1), out1.shape
    assert jnp.allclose(out1, ref1, atol=2e-2, rtol=2e-2), (out1, ref1)

    # Multi-step grid (2 steps of 256 rows): resident weights + parallel axis
    # + ragged-batch padding sliced off.
    x2 = jax.random.normal(jax.random.PRNGKey(1), (300, 5), dtype=jnp.float32)
    out2 = jax.block_until_ready(lr_forward(x2, prep))
    ref2 = reference_forward(x2, params, prep["bf16_epilogue"])
    assert out2.shape == (300, 1), out2.shape
    assert jnp.allclose(out2, ref2, atol=2e-2, rtol=2e-2), (out2, ref2)

    print("KERNEL_OK")
</pallas_src>

<mosaic_0001>
module attributes {stable_mosaic.version = 11 : i64} {
  func.func @lr_mlp_kernel(%arg0: i32, %arg1: memref<128x8xbf16, #tpu.memory_space<vmem>>, %arg2: memref<8x128xbf16, #tpu.memory_space<vmem>>, %arg3: memref<1x128xbf16, #tpu.memory_space<vmem>>, %arg4: memref<128x256xbf16, #tpu.memory_space<vmem>>, %arg5: memref<1x256xbf16, #tpu.memory_space<vmem>>, %arg6: memref<256x256xbf16, #tpu.memory_space<vmem>>, %arg7: memref<1x256xbf16, #tpu.memory_space<vmem>>, %arg8: memref<256x256xbf16, #tpu.memory_space<vmem>>, %arg9: memref<1x256xbf16, #tpu.memory_space<vmem>>, %arg10: memref<1x256xbf16, #tpu.memory_space<vmem>>, %arg11: memref<1x1xf32, #tpu.memory_space<vmem>>, %arg12: memref<1x1x128xf32, #tpu.memory_space<vmem>>) attributes {dimension_semantics = [#tpu.dimension_semantics<parallel>], iteration_bounds = array<i64: 1>, scalar_prefetch = 0 : i64, scratch_operands = 0 : i64, tpu.core_type = #tpu.core_type<tc>, window_params = [{transform_indices = @transform_0, window_bounds = array<i64: 128, 8>}, {pipeline_mode = #tpu.pipeline_mode<synchronous>, transform_indices = @transform_1, window_bounds = array<i64: 8, 128>}, {pipeline_mode = #tpu.pipeline_mode<synchronous>, transform_indices = @transform_2, window_bounds = array<i64: 1, 128>}, {pipeline_mode = #tpu.pipeline_mode<synchronous>, transform_indices = @transform_3, window_bounds = array<i64: 128, 256>}, {pipeline_mode = #tpu.pipeline_mode<synchronous>, transform_indices = @transform_4, window_bounds = array<i64: 1, 256>}, {pipeline_mode = #tpu.pipeline_mode<synchronous>, transform_indices = @transform_5, window_bounds = array<i64: 256, 256>}, {pipeline_mode = #tpu.pipeline_mode<synchronous>, transform_indices = @transform_6, window_bounds = array<i64: 1, 256>}, {pipeline_mode = #tpu.pipeline_mode<synchronous>, transform_indices = @transform_7, window_bounds = array<i64: 256, 256>}, {pipeline_mode = #tpu.pipeline_mode<synchronous>, transform_indices = @transform_8, window_bounds = array<i64: 1, 256>}, {pipeline_mode = #tpu.pipeline_mode<synchronous>, transform_indices = @transform_9, window_bounds = array<i64: 1, 256>}, {pipeline_mode = #tpu.pipeline_mode<synchronous>, transform_indices = @transform_10, window_bounds = array<i64: 1, 1>}, {transform_indices = @transform_11, window_bounds = array<i64: 1, 1, 128>}]} {
    %c0 = arith.constant 0 : index
    %c0_0 = arith.constant 0 : index
    %0 = vector.load %arg1[%c0, %c0_0] : memref<128x8xbf16, #tpu.memory_space<vmem>>, vector<128x8xbf16>
    %c0_1 = arith.constant 0 : index
    %c0_2 = arith.constant 0 : index
    %1 = vector.load %arg2[%c0_1, %c0_2] : memref<8x128xbf16, #tpu.memory_space<vmem>>, vector<8x128xbf16>
    %cst = arith.constant dense<0.000000e+00> : vector<128x128xf32>
    %2 = tpu.matmul %0, %1, %cst {dimension_numbers = #tpu.dot_dimension_numbers<[1], [0], [0], [1], [0, 0, 1, 1], [], []>} : vector<128x8xbf16>, vector<8x128xbf16>, vector<128x128xf32> -> vector<128x128xf32>
    %3 = arith.truncf %2 : vector<128x128xf32> to vector<128x128xbf16>
    %c0_3 = arith.constant 0 : index
    %c0_4 = arith.constant 0 : index
    %4 = vector.load %arg3[%c0_3, %c0_4] : memref<1x128xbf16, #tpu.memory_space<vmem>>, vector<1x128xbf16>
    %5 = vector.broadcast %4 : vector<1x128xbf16> to vector<128x128xbf16>
    %6 = arith.addf %3, %5 : vector<128x128xbf16>
    %cst_5 = arith.constant 0.000000e+00 : bf16
    %7 = vector.broadcast %cst_5 : bf16 to vector<128x128xbf16>
    %8 = arith.maximumf %6, %7 : vector<128x128xbf16>
    %c0_6 = arith.constant 0 : index
    %c0_7 = arith.constant 0 : index
    %9 = vector.load %arg4[%c0_6, %c0_7] : memref<128x256xbf16, #tpu.memory_space<vmem>>, vector<128x256xbf16>
    %cst_8 = arith.constant dense<0.000000e+00> : vector<128x256xf32>
    %10 = tpu.matmul %8, %9, %cst_8 {dimension_numbers = #tpu.dot_dimension_numbers<[1], [0], [0], [1], [0, 0, 1, 1], [], []>} : vector<128x128xbf16>, vector<128x256xbf16>, vector<128x256xf32> -> vector<128x256xf32>
    %11 = arith.truncf %10 : vector<128x256xf32> to vector<128x256xbf16>
    %c0_9 = arith.constant 0 : index
    %c0_10 = arith.constant 0 : index
    %12 = vector.load %arg5[%c0_9, %c0_10] : memref<1x256xbf16, #tpu.memory_space<vmem>>, vector<1x256xbf16>
    %13 = vector.broadcast %12 : vector<1x256xbf16> to vector<128x256xbf16>
    %14 = arith.addf %11, %13 : vector<128x256xbf16>
    %cst_11 = arith.constant 0.000000e+00 : bf16
    %15 = vector.broadcast %cst_11 : bf16 to vector<128x256xbf16>
    %16 = arith.maximumf %14, %15 : vector<128x256xbf16>
    %c0_12 = arith.constant 0 : index
    %c0_13 = arith.constant 0 : index
    %17 = vector.load %arg6[%c0_12, %c0_13] : memref<256x256xbf16, #tpu.memory_space<vmem>>, vector<256x256xbf16>
    %cst_14 = arith.constant dense<0.000000e+00> : vector<128x256xf32>
    %18 = tpu.matmul %16, %17, %cst_14 {dimension_numbers = #tpu.dot_dimension_numbers<[1], [0], [0], [1], [0, 0, 1, 1], [], []>} : vector<128x256xbf16>, vector<256x256xbf16>, vector<128x256xf32> -> vector<128x256xf32>
    %19 = arith.truncf %18 : vector<128x256xf32> to vector<128x256xbf16>
    %c0_15 = arith.constant 0 : index
    %c0_16 = arith.constant 0 : index
    %20 = vector.load %arg7[%c0_15, %c0_16] : memref<1x256xbf16, #tpu.memory_space<vmem>>, vector<1x256xbf16>
    %21 = vector.broadcast %20 : vector<1x256xbf16> to vector<128x256xbf16>
    %22 = arith.addf %19, %21 : vector<128x256xbf16>
    %cst_17 = arith.constant 0.000000e+00 : bf16
    %23 = vector.broadcast %cst_17 : bf16 to vector<128x256xbf16>
    %24 = arith.maximumf %22, %23 : vector<128x256xbf16>
    %c0_18 = arith.constant 0 : index
    %c0_19 = arith.constant 0 : index
    %25 = vector.load %arg8[%c0_18, %c0_19] : memref<256x256xbf16, #tpu.memory_space<vmem>>, vector<256x256xbf16>
    %cst_20 = arith.constant dense<0.000000e+00> : vector<128x256xf32>
    %26 = tpu.matmul %24, %25, %cst_20 {dimension_numbers = #tpu.dot_dimension_numbers<[1], [0], [0], [1], [0, 0, 1, 1], [], []>} : vector<128x256xbf16>, vector<256x256xbf16>, vector<128x256xf32> -> vector<128x256xf32>
    %27 = arith.truncf %26 : vector<128x256xf32> to vector<128x256xbf16>
    %c0_21 = arith.constant 0 : index
    %c0_22 = arith.constant 0 : index
    %28 = vector.load %arg9[%c0_21, %c0_22] : memref<1x256xbf16, #tpu.memory_space<vmem>>, vector<1x256xbf16>
    %29 = vector.broadcast %28 : vector<1x256xbf16> to vector<128x256xbf16>
    %30 = arith.addf %27, %29 : vector<128x256xbf16>
    %cst_23 = arith.constant 0.000000e+00 : bf16
    %31 = vector.broadcast %cst_23 : bf16 to vector<128x256xbf16>
    %32 = arith.maximumf %30, %31 : vector<128x256xbf16>
    %c0_24 = arith.constant 0 : index
    %c0_25 = arith.constant 0 : index
    %33 = vector.load %arg10[%c0_24, %c0_25] : memref<1x256xbf16, #tpu.memory_space<vmem>>, vector<1x256xbf16>
    %cst_26 = arith.constant dense<0.000000e+00> : vector<1x128xf32>
    %34 = tpu.matmul %33, %32, %cst_26 {dimension_numbers = #tpu.dot_dimension_numbers<[1], [1], [0], [0], [0, 0, 1, 0], [], []>} : vector<1x256xbf16>, vector<128x256xbf16>, vector<1x128xf32> -> vector<1x128xf32>
    %c0_27 = arith.constant 0 : index
    %c0_28 = arith.constant 0 : index
    %35 = vector.load %arg11[%c0_27, %c0_28] : memref<1x1xf32, #tpu.memory_space<vmem>>, vector<1x1xf32>
    %36 = vector.broadcast %35 : vector<1x1xf32> to vector<1x128xf32>
    %37 = arith.addf %34, %36 : vector<1x128xf32>
    %c0_29 = arith.constant 0 : index
    %c0_30 = arith.constant 0 : index
    %c0_31 = arith.constant 0 : index
    %38 = vector.load %arg12[%c0_29, %c0_30, %c0_31] : memref<1x1x128xf32, #tpu.memory_space<vmem>>, vector<1x1x128xf32>
    %39 = vector.shape_cast %38 : vector<1x1x128xf32> to vector<1x128xf32>
    %40 = vector.shape_cast %37 : vector<1x128xf32> to vector<1x1x128xf32>
    tpu.vector_store %arg12[%c0_29, %c0_30, %c0_31], %40 {strides = array<i32>} : memref<1x1x128xf32, #tpu.memory_space<vmem>>, vector<1x1x128xf32>,
    return
  }
  func.func @transform_0(%arg0: i32) -> (i32, i32) {
    %c0_i32 = arith.constant 0 : i32
    %c0_i32_0 = arith.constant 0 : i32
    return %arg0, %c0_i32 : i32, i32
  }
  func.func @transform_1(%arg0: i32) -> (i32, i32) {
    %c0_i32 = arith.constant 0 : i32
    %c0_i32_0 = arith.constant 0 : i32
    %c0_i32_1 = arith.constant 0 : i32
    return %c0_i32, %c0_i32_0 : i32, i32
  }
  func.func @transform_2(%arg0: i32) -> (i32, i32) {
    %c0_i32 = arith.constant 0 : i32
    %c0_i32_0 = arith.constant 0 : i32
    %c0_i32_1 = arith.constant 0 : i32
    return %c0_i32, %c0_i32_0 : i32, i32
  }
  func.func @transform_3(%arg0: i32) -> (i32, i32) {
    %c0_i32 = arith.constant 0 : i32
    %c0_i32_0 = arith.constant 0 : i32
    %c0_i32_1 = arith.constant 0 : i32
    return %c0_i32, %c0_i32_0 : i32, i32
  }
  func.func @transform_4(%arg0: i32) -> (i32, i32) {
    %c0_i32 = arith.constant 0 : i32
    %c0_i32_0 = arith.constant 0 : i32
    %c0_i32_1 = arith.constant 0 : i32
    return %c0_i32, %c0_i32_0 : i32, i32
  }
  func.func @transform_5(%arg0: i32) -> (i32, i32) {
    %c0_i32 = arith.constant 0 : i32
    %c0_i32_0 = arith.constant 0 : i32
    %c0_i32_1 = arith.constant 0 : i32
    return %c0_i32, %c0_i32_0 : i32, i32
  }
  func.func @transform_6(%arg0: i32) -> (i32, i32) {
    %c0_i32 = arith.constant 0 : i32
    %c0_i32_0 = arith.constant 0 : i32
    %c0_i32_1 = arith.constant 0 : i32
    return %c0_i32, %c0_i32_0 : i32, i32
  }
  func.func @transform_7(%arg0: i32) -> (i32, i32) {
    %c0_i32 = arith.constant 0 : i32
    %c0_i32_0 = arith.constant 0 : i32
    %c0_i32_1 = arith.constant 0 : i32
    return %c0_i32, %c0_i32_0 : i32, i32
  }
  func.func @transform_8(%arg0: i32) -> (i32, i32) {
    %c0_i32 = arith.constant 0 : i32
    %c0_i32_0 = arith.constant 0 : i32
    %c0_i32_1 = arith.constant 0 : i32
    return %c0_i32, %c0_i32_0 : i32, i32
  }
  func.func @transform_9(%arg0: i32) -> (i32, i32) {
    %c0_i32 = arith.constant 0 : i32
    %c0_i32_0 = arith.constant 0 : i32
    %c0_i32_1 = arith.constant 0 : i32
    return %c0_i32, %c0_i32_0 : i32, i32
  }
  func.func @transform_10(%arg0: i32) -> (i32, i32) {
    %c0_i32 = arith.constant 0 : i32
    %c0_i32_0 = arith.constant 0 : i32
    %c0_i32_1 = arith.constant 0 : i32
    return %c0_i32, %c0_i32_0 : i32, i32
  }
  func.func @transform_11(%arg0: i32) -> (i32, i32, i32) {
    %c0_i32 = arith.constant 0 : i32
    %c0_i32_0 = arith.constant 0 : i32
    %c0_i32_1 = arith.constant 0 : i32
    return %arg0, %c0_i32, %c0_i32_0 : i32, i32, i32
  }
}

</mosaic_0001>

<bundles_post_ra>
// kernel: tpu_custom_call.1
= control target key start
LH: loop header
LB: loop body
LE: loop exit
PB: predicated region body
PF: predicated region fallthrough
CT: control target
= control target key end

     0   :  { %s2166_s0 = inlined_call_operand.vmem [shape: bf16[128,8], index: 0, kind: input, shape index: {}]   ;;  %s2167_s1 = inlined_call_operand.vmem [shape: bf16[8,128], index: 1, kind: input, shape index: {}]   ;;  %s2168_s2 = inlined_call_operand.vmem [shape: bf16[1,128], index: 2, kind: input, shape index: {}]   ;;  %s2169_s3 = inlined_call_operand.hbm [shape: bf16[128,256], index: 3, kind: input, shape index: {}]   ;;  %s2170_s4 = inlined_call_operand.vmem [shape: bf16[1,256], index: 4, kind: input, shape index: {}]   ;;  %s2171_s5 = inlined_call_operand.hbm [shape: bf16[256,256], index: 5, kind: input, shape index: {}]   ;;  %s2172_s6 = inlined_call_operand.vmem [shape: bf16[1,256], index: 6, kind: input, shape index: {}]   ;;  %s2173_s7 = inlined_call_operand.hbm [shape: bf16[256,256], index: 7, kind: input, shape index: {}]   ;;  %s2174_s8 = inlined_call_operand.vmem [shape: bf16[1,256], index: 8, kind: input, shape index: {}]   ;;  %s2175_s9 = inlined_call_operand.vmem [shape: bf16[1,256], index: 9, kind: input, shape index: {}]   ;;  %s2176_s10 = inlined_call_operand.<no memory space> [shape: f32[1,1], index: 10, kind: input, shape index: {}]   ;;  %s2177_s11 = inlined_call_operand.hbm [shape: f32[1,1,128], index: 11, kind: output, shape index: {}]  }
   0x1   :  { %v16_v0 = vstv %s2176_s10 }
   0x2   :  { %17 = vst [vmem:[#allocation2] sm:$0x1] %v16_v0 }
   0x3   :  { %18 = vsyncpa [#allocation4], 0 }
   0x4   :  { %19 = vsyncpa [#allocation7], 0 }
   0x5   :  { %20 = vsyncpa [#allocation5], 0  ;;  %s1827_s19 = smov [#allocation6]   ;;  %s1828_s21 = smov [#allocation3]  }
   0x6   :  { %s46_s20 = sshll.u32 %s1827_s19, 4  ;;  %s32_s22 = sshll.u32 %s1828_s21, 4  ;;  %s47_s20 = int_to_ptr.vmem [resolvable:$true] %s46_s20  ;;  %s1898_s22 = int_to_ptr.vmem [resolvable:$true] %s32_s22 }
   0x7   :  { %s1733_s25 = scalar_lea.hbm %s2171_s5, 4096 }
   0x8   :  { %p1734_p0 = scmp.ne.s32.totalorder %s2171_s5, %s1733_s25  ;;  %p1737_p1 = scmp.lt.u32.totalorder %s1733_s25, %s2171_s5 }
   0xa   :  { %p1739_p2 = pnand %p1737_p1, %p1734_p0 }
   0xc   :  { %1742 = shalt.err (!%p1739_p2)
}
   0xd   :  { %s1743_s29 = scalar_lea.vmem %s47_s20, 4096  ;;  %p1748_p4 = scmp.lt.s32.totalorder %s47_s20, %s47_s20 }
   0xe   :  { %p1744_p3 = scmp.ne.s32.totalorder %s47_s20, %s1743_s29  ;;  %p1749_p5 = scmp.lt.s32.totalorder %s1743_s29, %s1743_s29 }
  0x10   :  { %p1750_p6 = por %p1749_p5, %p1748_p4 }
  0x12   :  { %p1751_p7 = pnand %p1750_p6, %p1744_p3 }
  0x14   :  { %1754 = shalt.err (!%p1751_p7)
}
  0x15   :  { %s1829_s30 = smov 128   ;;  %s1830_s12 = smov 8  }
  0x16   :  { %52 = dma.hbm_to_vmem [thread:$0]  %s2171_s5, 4096, %s47_s20, [#allocation7], %s1829_s30, %s1829_s30, %s1830_s12  }
  0x17   :  { %s1755_s17 = scalar_lea.hbm %s2169_s3, 2048 }
  0x18   :  { %p1756_p8 = scmp.ne.s32.totalorder %s2169_s3, %s1755_s17  ;;  %p1759_p9 = scmp.lt.u32.totalorder %s1755_s17, %s2169_s3 }
  0x1a   :  { %p1761_p10 = pnand %p1759_p9, %p1756_p8 }
  0x1c   :  { %1764 = shalt.err (!%p1761_p10)
}
  0x1d   :  { %s1765_s24 = scalar_lea.vmem %s1898_s22, 2048  ;;  %p1770_p12 = scmp.lt.s32.totalorder %s1898_s22, %s1898_s22 }
  0x1e   :  { %p1766_p11 = scmp.ne.s32.totalorder %s1898_s22, %s1765_s24  ;;  %p1771_p13 = scmp.lt.s32.totalorder %s1765_s24, %s1765_s24 }
  0x20   :  { %p1772_p0 = por %p1771_p13, %p1770_p12 }
  0x22   :  { %p1773_p1 = pnand %p1772_p0, %p1766_p11 }
  0x24   :  { %1776 = shalt.err (!%p1773_p1)
}
  0x25   :  { %38 = dma.hbm_to_vmem [thread:$0]  %s2169_s3, 2048, %s1898_s22, [#allocation4], %s1829_s30, %s1829_s30, %s1830_s12  }
  0x26   :  { %s1831_s25 = smov [#allocation8]   ;;  %s1777_s28 = scalar_lea.hbm %s2173_s7, 4096 }
  0x27   :  { %s60_s26 = sshll.u32 %s1831_s25, 4  ;;  %p1778_p2 = scmp.ne.s32.totalorder %s2173_s7, %s1777_s28  ;;  %s61_s26 = int_to_ptr.vmem [resolvable:$true] %s60_s26 }
  0x28   :  { %p1781_p3 = scmp.lt.u32.totalorder %s1777_s28, %s2173_s7 }
  0x2a   :  { %p1783_p4 = pnand %p1781_p3, %p1778_p2 }
  0x2c   :  { %1786 = shalt.err (!%p1783_p4)
}
  0x2d   :  { %s1787_s16 = scalar_lea.vmem %s61_s26, 4096  ;;  %p1792_p6 = scmp.lt.s32.totalorder %s61_s26, %s61_s26 }
  0x2e   :  { %p1788_p5 = scmp.ne.s32.totalorder %s61_s26, %s1787_s16  ;;  %p1793_p7 = scmp.lt.s32.totalorder %s1787_s16, %s1787_s16 }
  0x30   :  { %p1794_p8 = por %p1793_p7, %p1792_p6 }
  0x32   :  { %p1795_p9 = pnand %p1794_p8, %p1788_p5 }
  0x34   :  { %1798 = shalt.err (!%p1795_p9)
}
  0x35   :  { %66 = dma.hbm_to_vmem [thread:$0]  %s2173_s7, 4096, %s61_s26, [#allocation7], %s1829_s30, %s1829_s30, %s1830_s12  }
  0x36   :  { %1821 = dma.done.wait [#allocation4], 2048  }
  0x37   :  { %1822 = vsyncadd [#allocation4], 4294965248 }
  0x38   :  { %1823 = dma.done.wait [#allocation7], 8192  }
  0x39   :  { %1824 = vsyncadd [#allocation7], 4294959104  ;;  %vm165_vm0 = vcmask 1043456   ;;  %vm140_vm1 = vcmask 64512   ;;  %v99_v1 = vld [vmem:[%s2167_s1] sm:$0xf]  ;;  %v278_v56 = vlaneseq }
  0x3a   :  { %1595 = vmatprep.subr.msk.bf16.mxu0 %vm165_vm0, %v99_v1  ;;  %v167_v2 = vsel %vm165_vm0, %v99_v1, 0  ;;  %v1605_v3 = vld [vmem:[%s2166_s0] sm:$0xff]   ;;  %v1606_v4 = vld [vmem:[%s2166_s0 + $0x8] sm:$0xff]   ;;  %v1607_v5 = vld [vmem:[%s2166_s0 + $0x10] sm:$0xff]   ;;  %v1832_v27 = vmov 0  }
  0x3b   :  { %1578 = vmatpush3.bf16.msra.mxu0 %v167_v2  ;;  %1579 = vmatprep.mubr.msk.bf16.mxu0 %vm140_vm1, %v1605_v3  ;;  %v1608_v6 = vld [vmem:[%s2166_s0 + $0x18] sm:$0xff]   ;;  %v1613_v7 = vld [vmem:[#allocation3 + $0x4] ss:$8 sps:$4 sm:$0xff]   ;;  %v1615_v8 = vld [vmem:[#allocation3] ss:$8 sps:$4 sm:$0xff]   ;;  %v1987_v57 = vshrl.u32 %v278_v56, 7 }
  0x3c   :  { %v1609_v9 = vld [vmem:[%s2166_s0 + $0x20] sm:$0xff]   ;;  %394 = vmatprep.subr.bf16.mxu1 %v1613_v7  ;;  %v1618_v11 = vld [vmem:[#allocation3 + $0x10] ss:$8 sps:$4 sm:$0xff]   ;;  %v1610_v13 = vld [vmem:[%s2166_s0 + $0x28] sm:$0xff]   ;;  %426 = vmatprep.mubr.bf16.mxu1 %v1832_v27 }
  0x3d   :  { %v1616_v10 = vld [vmem:[#allocation3 + $0x14] ss:$8 sps:$4 sm:$0xff]   ;;  %395 = vmatpush1.bf16.msra.mxu1 %v1615_v8  ;;  %v1619_v12 = vld [vmem:[#allocation3 + $0x24] ss:$8 sps:$4 sm:$0xff]   ;;  %v1621_v14 = vld [vmem:[#allocation3 + $0x20] ss:$8 sps:$4 sm:$0xff]   ;;  %1604 = vset.pattern.permute.xlu0 %v1832_v27 }
  0x3e   :  { %1580 = vmatmul.mubr.msk.bf16.vlgmr.msra.gmra.mrb[0].mxu0 %vm140_vm1, %v1606_v4  ;;  %396 = vmatprep.subr.bf16.mxu1 %v1616_v10  ;;  %v1611_v15 = vld [vmem:[%s2166_s0 + $0x30] sm:$0xff]   ;;  %v1627_v19 = vld [vmem:[#allocation3 + $0x40] ss:$8 sps:$4 sm:$0xff]   ;;  %v1612_v20 = vld [vmem:[%s2166_s0 + $0x38] sm:$0xff]   ;;  %v1993_v60 = vsub.s32 0, %v1987_v57 }
  0x3f   :  { %1583 = vmatprep.mubr.msk.bf16.mxu0 %vm140_vm1, %v1607_v5  ;;  %v1622_v16 = vld [vmem:[#allocation3 + $0x34] ss:$8 sps:$4 sm:$0xff]   ;;  %v1624_v17 = vld [vmem:[#allocation3 + $0x30] ss:$8 sps:$4 sm:$0xff]   ;;  %v1625_v18 = vld [vmem:[#allocation3 + $0x44] ss:$8 sps:$4 sm:$0xff]  }
  0x40   :  { %v1628_v21 = vld [vmem:[#allocation3 + $0x54] ss:$8 sps:$4 sm:$0xff]   ;;  %v1630_v22 = vld [vmem:[#allocation3 + $0x50] ss:$8 sps:$4 sm:$0xff]   ;;  %v1631_v23 = vld [vmem:[#allocation3 + $0x64] ss:$8 sps:$4 sm:$0xff]  }
  0x41   :  { %397 = vmatpush1.bf16.msra.mxu1 %v1618_v11  ;;  %v1633_v24 = vld [vmem:[#allocation3 + $0x60] ss:$8 sps:$4 sm:$0xff]   ;;  %v1634_v25 = vld [vmem:[#allocation3 + $0x74] ss:$8 sps:$4 sm:$0xff]   ;;  %v1636_v26 = vld [vmem:[#allocation3 + $0x70] ss:$8 sps:$4 sm:$0xff]  }
  0x42   :  { %398 = vmatprep.subr.bf16.mxu1 %v1619_v12  ;;  %v1637_v28 = vld [vmem:[#allocation6] ss:$8 sps:$4 sm:$0xff]   ;;  %v1639_v29 = vld [vmem:[#allocation6 + $0x4] ss:$8 sps:$4 sm:$0xff]   ;;  %v1642_v30 = vld [vmem:[#allocation6 + $0x14] ss:$8 sps:$4 sm:$0xff]  }
  0x43   :  { %785 = vmatprep.subr.bf16.mxu0 %v1639_v29  ;;  %v1640_v31 = vld [vmem:[#allocation6 + $0x10] ss:$8 sps:$4 sm:$0xff]   ;;  %v1645_v32 = vld [vmem:[#allocation6 + $0x24] ss:$8 sps:$4 sm:$0xff]   ;;  %v1643_v33 = vld [vmem:[#allocation6 + $0x20] ss:$8 sps:$4 sm:$0xff]  }
  0x44   :  { %786 = vmatpush1.bf16.msra.mxu0 %v1637_v28  ;;  %v1648_v34 = vld [vmem:[#allocation6 + $0x34] ss:$8 sps:$4 sm:$0xff]   ;;  %v1646_v35 = vld [vmem:[#allocation6 + $0x30] ss:$8 sps:$4 sm:$0xff]   ;;  %v1651_v36 = vld [vmem:[#allocation6 + $0x44] ss:$8 sps:$4 sm:$0xff]  }
  0x45   :  { %399 = vmatpush1.bf16.msra.mxu1 %v1621_v14  ;;  %787 = vmatprep.subr.bf16.mxu0 %v1642_v30  ;;  %v1649_v37 = vld [vmem:[#allocation6 + $0x40] ss:$8 sps:$4 sm:$0xff]   ;;  %v1654_v38 = vld [vmem:[#allocation6 + $0x54] ss:$8 sps:$4 sm:$0xff]   ;;  %v1652_v39 = vld [vmem:[#allocation6 + $0x50] ss:$8 sps:$4 sm:$0xff]  }
  0x46   :  { %1584 = vmatmul.mubr.msk.bf16.gmra.mrb[4].mxu0 %vm140_vm1, %v1608_v6  ;;  %400 = vmatprep.subr.bf16.mxu1 %v1622_v16  ;;  %v1657_v40 = vld [vmem:[#allocation6 + $0x64] ss:$8 sps:$4 sm:$0xff]   ;;  %v1655_v41 = vld [vmem:[#allocation6 + $0x60] ss:$8 sps:$4 sm:$0xff]   ;;  %v1660_v42 = vld [vmem:[#allocation6 + $0x74] ss:$8 sps:$4 sm:$0xff]  }
  0x47   :  { %1587 = vmatprep.mubr.msk.bf16.mxu0 %vm140_vm1, %v1609_v9  ;;  %v1658_v43 = vld [vmem:[#allocation6 + $0x70] ss:$8 sps:$4 sm:$0xff]   ;;  %v1663_v44 = vld [vmem:[#allocation6 + $0x84] ss:$8 sps:$4 sm:$0xff]   ;;  %v1661_v45 = vld [vmem:[#allocation6 + $0x80] ss:$8 sps:$4 sm:$0xff]  }
  0x48   :  { %788 = vmatpush1.bf16.msra.mxu0 %v1640_v31  ;;  %v1666_v46 = vld [vmem:[#allocation6 + $0x94] ss:$8 sps:$4 sm:$0xff]   ;;  %v1664_v47 = vld [vmem:[#allocation6 + $0x90] ss:$8 sps:$4 sm:$0xff]   ;;  %v1669_v48 = vld [vmem:[#allocation6 + $0xa4] ss:$8 sps:$4 sm:$0xff]  }
  0x49   :  { %401 = vmatpush1.bf16.msra.mxu1 %v1624_v17  ;;  %789 = vmatprep.subr.bf16.mxu0 %v1645_v32  ;;  %v1667_v49 = vld [vmem:[#allocation6 + $0xa0] ss:$8 sps:$4 sm:$0xff]   ;;  %v1672_v50 = vld [vmem:[#allocation6 + $0xb4] ss:$8 sps:$4 sm:$0xff]   ;;  %v1670_v51 = vld [vmem:[#allocation6 + $0xb0] ss:$8 sps:$4 sm:$0xff]  }
  0x4a   :  { %402 = vmatprep.subr.bf16.mxu1 %v1625_v18  ;;  %v1675_v52 = vld [vmem:[#allocation6 + $0xc4] ss:$8 sps:$4 sm:$0xff]   ;;  %v1673_v53 = vld [vmem:[#allocation6 + $0xc0] ss:$8 sps:$4 sm:$0xff]   ;;  %v1678_v54 = vld [vmem:[#allocation6 + $0xd4] ss:$8 sps:$4 sm:$0xff]  }
  0x4b   :  { %v1676_v55 = vld [vmem:[#allocation6 + $0xd0] ss:$8 sps:$4 sm:$0xff]   ;;  %v274_v58 = vld [vmem:[%s2168_s2] sm:$0x1]  ;;  %v1703_v56 = vld [vmem:[#allocation8 + $0x60] ss:$8 sps:$4 sm:$0xff]  }
  0x4c   :  { %790 = vmatpush1.bf16.msra.mxu0 %v1643_v33  ;;  %v276_v59 = vpack.i.b16 %v274_v58, %v274_v58  ;;  %v1708_v58 = vld [vmem:[#allocation8 + $0x74] ss:$8 sps:$4 sm:$0xff]  }
  0x4d   :  { %403 = vmatpush1.bf16.msra.mxu1 %v1627_v19  ;;  %791 = vmatprep.subr.bf16.mxu0 %v1648_v34 }
  0x4e   :  { %1588 = vmatmul.mubr.msk.bf16.gmra.mrb[8].mxu0 %vm140_vm1, %v1610_v13  ;;  %404 = vmatprep.subr.bf16.mxu1 %v1628_v21  ;;  %v281_v0 = vrot.slane %v276_v59, %v1993_v60  ;;  %v1706_v59 = vld [vmem:[#allocation8 + $0x70] ss:$8 sps:$4 sm:$0xff]  }
  0x4f   :  { %1591 = vmatprep.mubr.msk.bf16.mxu0 %vm140_vm1, %v1611_v15 }
  0x50   :  { %792 = vmatpush1.bf16.msra.mxu0 %v1646_v35 }
  0x51   :  { %405 = vmatpush1.bf16.msra.mxu1 %v1630_v22  ;;  %793 = vmatprep.subr.bf16.mxu0 %v1651_v36 }
  0x52   :  { %406 = vmatprep.subr.bf16.mxu1 %v1631_v23 }
  0x54   :  { %794 = vmatpush1.bf16.msra.mxu0 %v1649_v37 }
  0x55   :  { %407 = vmatpush1.bf16.msra.mxu1 %v1633_v24  ;;  %795 = vmatprep.subr.bf16.mxu0 %v1654_v38 }
  0x56   :  { %1592 = vmatmul.mubr.msk.bf16.gmra.mrb[12].mxu0 %vm140_vm1, %v1612_v20  ;;  %408 = vmatprep.subr.bf16.mxu1 %v1634_v25 }
  0x58   :  { %796 = vmatpush1.bf16.msra.mxu0 %v1652_v39  ;;  %v1681_v39 = vld [vmem:[#allocation6 + $0xe4] ss:$8 sps:$4 sm:$0xff]  }
  0x59   :  { %409 = vmatpush1.bf16.msra.mxu1 %v1636_v26  ;;  %797 = vmatprep.subr.bf16.mxu0 %v1657_v40  ;;  %v1679_v40 = vld [vmem:[#allocation6 + $0xe0] ss:$8 sps:$4 sm:$0xff]  }
  0x5c   :  { %798 = vmatpush1.bf16.msra.mxu0 %v1655_v41  ;;  %v1684_v41 = vld [vmem:[#allocation6 + $0xf4] ss:$8 sps:$4 sm:$0xff]  }
  0x5d   :  { %799 = vmatprep.subr.bf16.mxu0 %v1660_v42  ;;  %v1682_v42 = vld [vmem:[#allocation6 + $0xf0] ss:$8 sps:$4 sm:$0xff]  }
  0x60   :  { %800 = vmatpush1.bf16.msra.mxu0 %v1658_v43  ;;  %v1685_v43 = vld [vmem:[#allocation8] ss:$8 sps:$4 sm:$0xff]  }
  0x61   :  { %801 = vmatprep.subr.bf16.mxu0 %v1663_v44  ;;  %v1687_v44 = vld [vmem:[#allocation8 + $0x4] ss:$8 sps:$4 sm:$0xff]  }
  0x62   :  { %1176 = vmatprep.subr.bf16.mxu1 %v1687_v44 }
  0x64   :  { %802 = vmatpush1.bf16.msra.mxu0 %v1661_v45  ;;  %v1690_v45 = vld [vmem:[#allocation8 + $0x14] ss:$8 sps:$4 sm:$0xff]  }
  0x65   :  { %803 = vmatprep.subr.bf16.mxu0 %v1666_v46  ;;  %v1688_v46 = vld [vmem:[#allocation8 + $0x10] ss:$8 sps:$4 sm:$0xff]  }
  0x68   :  { %804 = vmatpush1.bf16.msra.mxu0 %v1664_v47  ;;  %v1693_v47 = vld [vmem:[#allocation8 + $0x24] ss:$8 sps:$4 sm:$0xff]  }
  0x69   :  { %805 = vmatprep.subr.bf16.mxu0 %v1669_v48  ;;  %v1691_v48 = vld [vmem:[#allocation8 + $0x20] ss:$8 sps:$4 sm:$0xff]  }
  0x6c   :  { %806 = vmatpush1.bf16.msra.mxu0 %v1667_v49  ;;  %v1696_v49 = vld [vmem:[#allocation8 + $0x34] ss:$8 sps:$4 sm:$0xff]  }
  0x6d   :  { %807 = vmatprep.subr.bf16.mxu0 %v1672_v50  ;;  %v1694_v50 = vld [vmem:[#allocation8 + $0x30] ss:$8 sps:$4 sm:$0xff]  }
  0x70   :  { %808 = vmatpush1.bf16.msra.mxu0 %v1670_v51  ;;  %v1699_v51 = vld [vmem:[#allocation8 + $0x44] ss:$8 sps:$4 sm:$0xff]  }
  0x71   :  { %809 = vmatprep.subr.bf16.mxu0 %v1675_v52  ;;  %v1697_v52 = vld [vmem:[#allocation8 + $0x40] ss:$8 sps:$4 sm:$0xff]  }
  0x74   :  { %810 = vmatpush1.bf16.msra.mxu0 %v1673_v53  ;;  %v1702_v53 = vld [vmem:[#allocation8 + $0x54] ss:$8 sps:$4 sm:$0xff]  }
  0x75   :  { %811 = vmatprep.subr.bf16.mxu0 %v1678_v54  ;;  %v1700_v54 = vld [vmem:[#allocation8 + $0x50] ss:$8 sps:$4 sm:$0xff]  }
  0x78   :  { %812 = vmatpush1.bf16.msra.mxu0 %v1676_v55  ;;  %v1705_v55 = vld [vmem:[#allocation8 + $0x64] ss:$8 sps:$4 sm:$0xff]  }
  0x79   :  { %813 = vmatprep.subr.bf16.mxu0 %v1681_v39 }
  0x7c   :  { %814 = vmatpush1.bf16.msra.mxu0 %v1679_v40 }
  0x7d   :  { %815 = vmatprep.subr.bf16.mxu0 %v1684_v41 }
  0x80   :  { %816 = vmatpush1.bf16.msra.mxu0 %v1682_v42 }
 0x111   :  { %v1581_v61 = vpop.f32.mrb[0].mxu0 }
 0x112   :  { %v203_v62 = vpop.f32.mrb[1].mxu0 }
 0x113   :  { %v1582_v63 = vpop.f32.mrb[2].mxu0 }
 0x114   :  { %v267_v1 = vpack.c.bf16 %v1582_v63, %v1581_v61  ;;  %v206_v2 = vpop.f32.mrb[3].mxu0  ;;  %v1711_v61 = vld [vmem:[#allocation8 + $0x84] ss:$8 sps:$4 sm:$0xff]   ;;  %v1714_v63 = vld [vmem:[#allocation8 + $0x94] ss:$8 sps:$4 sm:$0xff]  }
 0x115   :  { %v266_v3 = vpack.c.bf16 %v206_v2, %v203_v62  ;;  %v1709_v62 = vld [vmem:[#allocation8 + $0x80] ss:$8 sps:$4 sm:$0xff]  }
 0x116   :  { %v283_v11 = vadd.bf16 %v281_v0, %v267_v1  ;;  %v1717_v1 = vld [vmem:[#allocation8 + $0xa4] ss:$8 sps:$4 sm:$0xff]   ;;  %v1715_v2 = vld [vmem:[#allocation8 + $0xa0] ss:$8 sps:$4 sm:$0xff]  }
 0x117   :  { %v282_v4 = vadd.bf16 %v281_v0, %v266_v3  ;;  %v1720_v3 = vld [vmem:[#allocation8 + $0xb4] ss:$8 sps:$4 sm:$0xff]  }
 0x118   :  { %v291_v13 = vmax.bf16 %v1832_v27, %v283_v11  ;;  %v1726_v11 = vld [vmem:[#allocation8 + $0xd4] ss:$8 sps:$4 sm:$0xff]  }
 0x119   :  { %v290_v5 = vmax.bf16 %v1832_v27, %v282_v4  ;;  %v1585_v6 = vpop.f32.mrb[4].mxu0  ;;  %v1833_v4 = vmov 1966171168  }
 0x11a   :  { %v219_v7 = vpop.f32.mrb[5].mxu0 }
 0x11b   :  { %427 = vmatmul.mubr.bf16.vlgmr.msra.gmra.mrb[0].mxu1 %v290_v5  ;;  %v1586_v8 = vpop.f32.mrb[6].mxu0  ;;  %v534_v5 = vunpack.c.l.s4 %v1833_v4 }
 0x11c   :  { %v269_v9 = vpack.c.bf16 %v1586_v8, %v1585_v6  ;;  %v222_v10 = vpop.f32.mrb[7].mxu0  ;;  %436 = vmatprep.mubr.bf16.mxu1 %v1832_v27  ;;  %1177 = vmatpush1.bf16.msra.mxu1 %v1685_v43  ;;  %v1718_v6 = vld [vmem:[#allocation8 + $0xb0] ss:$8 sps:$4 sm:$0xff]  }
 0x11d   :  { %v268_v12 = vpack.c.bf16 %v222_v10, %v219_v7  ;;  %1178 = vmatprep.subr.bf16.mxu1 %v1690_v45  ;;  %v1723_v7 = vld [vmem:[#allocation8 + $0xc4] ss:$8 sps:$4 sm:$0xff]   ;;  %v535_v8 = vunpack.c.0.s8 %v534_v5  ;;  %v1500_v10 = vld.sshfl [vmem:[%s2170_s4] sm:$0x11 pattern:$0x75316420] }
 0x11e   :  { %v285_v28 = vadd.bf16 %v281_v0, %v269_v9  ;;  %v1721_v9 = vld [vmem:[#allocation8 + $0xc0] ss:$8 sps:$4 sm:$0xff]  }
 0x11f   :  { %v284_v19 = vadd.bf16 %v281_v0, %v268_v12  ;;  %v2015_v12 = vsub.s32 %v535_v8, %v1987_v57 }
 0x120   :  { %v293_v30 = vmax.bf16 %v1832_v27, %v285_v28  ;;  %1179 = vmatpush1.bf16.msra.mxu1 %v1688_v46 }
 0x121   :  { %v1589_v14 = vpop.f32.mrb[8].mxu0  ;;  %v292_v21 = vmax.bf16 %v1832_v27, %v284_v19  ;;  %1180 = vmatprep.subr.bf16.mxu1 %v1693_v47 }
 0x122   :  { %v235_v15 = vpop.f32.mrb[9].mxu0 }
 0x123   :  { %437 = vmatmul.mubr.bf16.gmra.mrb[4].mxu1 %v291_v13  ;;  %v1590_v16 = vpop.f32.mrb[10].mxu0  ;;  %v532_v13 = vcombine.high %v1500_v10, %v1500_v10 }
 0x124   :  { %446 = vmatprep.mubr.bf16.mxu1 %v1832_v27  ;;  %v271_v17 = vpack.c.bf16 %v1590_v16, %v1589_v14  ;;  %v238_v18 = vpop.f32.mrb[11].mxu0  ;;  %1181 = vmatpush1.bf16.msra.mxu1 %v1691_v48  ;;  %v1724_v14 = vld [vmem:[#allocation8 + $0xd0] ss:$8 sps:$4 sm:$0xff]  }
 0x125   :  { %v270_v20 = vpack.c.bf16 %v238_v18, %v235_v15  ;;  %1182 = vmatprep.subr.bf16.mxu1 %v1696_v49  ;;  %v539_v15 = vrot.slane %v1500_v10, %v2015_v12  ;;  %v546_v16 = vrot.slane %v532_v13, %v2015_v12 }
 0x126   :  { %v287_v33 = vadd.bf16 %v281_v0, %v271_v17 }
 0x127   :  { %v286_v31 = vadd.bf16 %v281_v0, %v270_v20  ;;  %v548_v17 = vpack.i.b16 %v539_v15, %v539_v15  ;;  %v555_v18 = vpack.i.b16 %v546_v16, %v546_v16 }
 0x128   :  { %v295_v34 = vmax.bf16 %v1832_v27, %v287_v33  ;;  %1183 = vmatpush1.bf16.msra.mxu1 %v1694_v50 }
 0x129   :  { %v1593_v22 = vpop.f32.mrb[12].mxu0  ;;  %v294_v32 = vmax.bf16 %v1832_v27, %v286_v31  ;;  %1184 = vmatprep.subr.bf16.mxu1 %v1699_v51  ;;  %v2023_v57 = vrot.slane %v555_v18, %v1993_v60 }
 0x12a   :  { %v251_v23 = vpop.f32.mrb[13].mxu0 }
 0x12b   :  { %447 = vmatmul.mubr.bf16.gmra.mrb[8].mxu1 %v292_v21  ;;  %v1594_v24 = vpop.f32.mrb[14].mxu0  ;;  %v2020_v21 = vrot.slane %v548_v17, %v1993_v60 }
 0x12c   :  { %456 = vmatprep.mubr.bf16.mxu1 %v1832_v27  ;;  %v273_v25 = vpack.c.bf16 %v1594_v24, %v1593_v22  ;;  %v254_v26 = vpop.f32.mrb[15].mxu0  ;;  %1185 = vmatpush1.bf16.msra.mxu1 %v1697_v52 }
 0x12d   :  { %v272_v29 = vpack.c.bf16 %v254_v26, %v251_v23  ;;  %1186 = vmatprep.subr.bf16.mxu1 %v1702_v53 }
 0x12e   :  { %v289_v37 = vadd.bf16 %v281_v0, %v273_v25 }
 0x12f   :  { %v288_v35 = vadd.bf16 %v281_v0, %v272_v29  ;;  %v1712_v0 = vld [vmem:[#allocation8 + $0x90] ss:$8 sps:$4 sm:$0xff]  }
 0x130   :  { %v297_v38 = vmax.bf16 %v1832_v27, %v289_v37  ;;  %1187 = vmatpush1.bf16.msra.mxu1 %v1700_v54 }
 0x131   :  { %v296_v36 = vmax.bf16 %v1832_v27, %v288_v35  ;;  %1188 = vmatprep.subr.bf16.mxu1 %v1705_v55 }
 0x133   :  { %457 = vmatmul.mubr.bf16.gmra.mrb[12].mxu1 %v293_v30 }
 0x134   :  { %466 = vmatprep.mubr.bf16.mxu1 %v1832_v27  ;;  %1189 = vmatpush1.bf16.msra.mxu1 %v1703_v56 }
 0x135   :  { %1190 = vmatprep.subr.bf16.mxu1 %v1708_v58 }
 0x138   :  { %1191 = vmatpush1.bf16.msra.mxu1 %v1706_v59 }
 0x139   :  { %1192 = vmatprep.subr.bf16.mxu1 %v1711_v61 }
 0x13b   :  { %467 = vmatmul.mubr.bf16.gmra.mrb[16].mxu1 %v294_v32 }
 0x13c   :  { %476 = vmatprep.mubr.bf16.mxu1 %v1832_v27  ;;  %1193 = vmatpush1.bf16.msra.mxu1 %v1709_v62 }
 0x13d   :  { %1194 = vmatprep.subr.bf16.mxu1 %v1714_v63 }
 0x140   :  { %1195 = vmatpush1.bf16.msra.mxu1 %v1712_v0 }
 0x141   :  { %1196 = vmatprep.subr.bf16.mxu1 %v1717_v1 }
 0x143   :  { %477 = vmatmul.mubr.bf16.gmra.mrb[20].mxu1 %v295_v34 }
 0x144   :  { %486 = vmatprep.mubr.bf16.mxu1 %v1832_v27  ;;  %1197 = vmatpush1.bf16.msra.mxu1 %v1715_v2 }
 0x145   :  { %1198 = vmatprep.subr.bf16.mxu1 %v1720_v3 }
 0x148   :  { %1199 = vmatpush1.bf16.msra.mxu1 %v1718_v6 }
 0x149   :  { %1200 = vmatprep.subr.bf16.mxu1 %v1723_v7 }
 0x14b   :  { %487 = vmatmul.mubr.bf16.gmra.mrb[24].mxu1 %v296_v36 }
 0x14c   :  { %496 = vmatprep.mubr.bf16.mxu1 %v1832_v27  ;;  %1201 = vmatpush1.bf16.msra.mxu1 %v1721_v9 }
 0x14d   :  { %1202 = vmatprep.subr.bf16.mxu1 %v1726_v11 }
 0x150   :  { %1203 = vmatpush1.bf16.msra.mxu1 %v1724_v14 }
 0x153   :  { %497 = vmatmul.mubr.bf16.gmra.mrb[28].mxu1 %v297_v38 }
 0x1ee   :  { %v428_v19 = vpop.f32.mrb[0].mxu1 }
 0x1ef   :  { %v430_v20 = vpop.f32.mrb[1].mxu1 }
 0x1f0   :  { %v432_v22 = vpop.f32.mrb[2].mxu1 }
 0x1f1   :  { %v507_v23 = vpack.c.bf16 %v432_v22, %v428_v19  ;;  %v434_v24 = vpop.f32.mrb[3].mxu1 }
 0x1f2   :  { %v508_v25 = vpack.c.bf16 %v434_v24, %v430_v20 }
 0x1f3   :  { %v561_v26 = vadd.bf16 %v2020_v21, %v507_v23 }
 0x1f4   :  { %v562_v28 = vadd.bf16 %v2023_v57, %v508_v25 }
 0x1f5   :  { %v577_v31 = vmax.bf16 %v1832_v27, %v561_v26 }
 0x1f6   :  { %v438_v29 = vpop.f32.mrb[4].mxu1  ;;  %v578_v30 = vmax.bf16 %v1832_v27, %v562_v28 }
 0x1f7   :  { %v440_v32 = vpop.f32.mrb[5].mxu1 }
 0x1f8   :  { %v442_v33 = vpop.f32.mrb[6].mxu1  ;;  %817 = vmatprep.mubr.bf16.mxu0 %v578_v30 }
 0x1f9   :  { %v509_v34 = vpack.c.bf16 %v442_v33, %v438_v29  ;;  %v444_v35 = vpop.f32.mrb[7].mxu1  ;;  %818 = vmatmul.mubr.bf16.vlgmr.msra.gmra.mrb[16].mxu0 %v577_v31 }
 0x1fa   :  { %v510_v36 = vpack.c.bf16 %v444_v35, %v440_v32 }
 0x1fb   :  { %v563_v37 = vadd.bf16 %v2020_v21, %v509_v34 }
 0x1fc   :  { %v564_v38 = vadd.bf16 %v2023_v57, %v510_v36 }
 0x1fd   :  { %v579_v42 = vmax.bf16 %v1832_v27, %v563_v37 }
 0x1fe   :  { %v448_v39 = vpop.f32.mrb[8].mxu1  ;;  %v580_v40 = vmax.bf16 %v1832_v27, %v564_v38 }
 0x1ff   :  { %v450_v41 = vpop.f32.mrb[9].mxu1 }
 0x200   :  { %v452_v43 = vpop.f32.mrb[10].mxu1  ;;  %827 = vmatprep.mubr.bf16.mxu0 %v580_v40 }
 0x201   :  { %v511_v44 = vpack.c.bf16 %v452_v43, %v448_v39  ;;  %v454_v45 = vpop.f32.mrb[11].mxu1  ;;  %828 = vmatmul.mubr.bf16.gmra.mrb[20].mxu0 %v579_v42  ;;  %v1729_v42 = vld [vmem:[#allocation8 + $0xe4] ss:$8 sps:$4 sm:$0xff]   ;;  %v1727_v43 = vld [vmem:[#allocation8 + $0xe0] ss:$8 sps:$4 sm:$0xff]  }
 0x202   :  { %v512_v46 = vpack.c.bf16 %v454_v45, %v450_v41  ;;  %1204 = vmatprep.subr.bf16.mxu1 %v1729_v42  ;;  %v1730_v45 = vld [vmem:[#allocation8 + $0xf0] ss:$8 sps:$4 sm:$0xff]  }
 0x203   :  { %v565_v47 = vadd.bf16 %v2020_v21, %v511_v44  ;;  %1205 = vmatpush1.bf16.msra.mxu1 %v1727_v43  ;;  %v1732_v44 = vld [vmem:[#allocation8 + $0xf4] ss:$8 sps:$4 sm:$0xff]  }
 0x204   :  { %v566_v48 = vadd.bf16 %v2023_v57, %v512_v46  ;;  %1206 = vmatprep.subr.bf16.mxu1 %v1732_v44 }
 0x205   :  { %v581_v52 = vmax.bf16 %v1832_v27, %v565_v47 }
 0x206   :  { %v458_v49 = vpop.f32.mrb[12].mxu1  ;;  %v582_v50 = vmax.bf16 %v1832_v27, %v566_v48 }
 0x207   :  { %v460_v51 = vpop.f32.mrb[13].mxu1  ;;  %1207 = vmatpush1.bf16.msra.mxu1 %v1730_v45 }
 0x208   :  { %v462_v53 = vpop.f32.mrb[14].mxu1  ;;  %837 = vmatprep.mubr.bf16.mxu0 %v582_v50 }
 0x209   :  { %v513_v54 = vpack.c.bf16 %v462_v53, %v458_v49  ;;  %v464_v55 = vpop.f32.mrb[15].mxu1  ;;  %838 = vmatmul.mubr.bf16.gmra.mrb[24].mxu0 %v581_v52 }
 0x20a   :  { %v514_v56 = vpack.c.bf16 %v464_v55, %v460_v51 }
 0x20b   :  { %v567_v58 = vadd.bf16 %v2020_v21, %v513_v54 }
 0x20c   :  { %v568_v59 = vadd.bf16 %v2023_v57, %v514_v56 }
 0x20d   :  { %v583_v0 = vmax.bf16 %v1832_v27, %v567_v58 }
 0x20e   :  { %v468_v61 = vpop.f32.mrb[16].mxu1  ;;  %v584_v62 = vmax.bf16 %v1832_v27, %v568_v59 }
 0x20f   :  { %v470_v63 = vpop.f32.mrb[17].mxu1 }
 0x210   :  { %v472_v1 = vpop.f32.mrb[18].mxu1  ;;  %847 = vmatprep.mubr.bf16.mxu0 %v584_v62 }
 0x211   :  { %v515_v2 = vpack.c.bf16 %v472_v1, %v468_v61  ;;  %v474_v3 = vpop.f32.mrb[19].mxu1  ;;  %848 = vmatmul.mubr.bf16.gmra.mrb[28].mxu0 %v583_v0 }
 0x212   :  { %v516_v4 = vpack.c.bf16 %v474_v3, %v470_v63 }
 0x213   :  { %v569_v5 = vadd.bf16 %v2020_v21, %v515_v2 }
 0x214   :  { %v570_v6 = vadd.bf16 %v2023_v57, %v516_v4 }
 0x215   :  { %v585_v10 = vmax.bf16 %v1832_v27, %v569_v5 }
 0x216   :  { %v478_v7 = vpop.f32.mrb[20].mxu1  ;;  %v586_v8 = vmax.bf16 %v1832_v27, %v570_v6 }
 0x217   :  { %v480_v9 = vpop.f32.mrb[21].mxu1 }
 0x218   :  { %v482_v11 = vpop.f32.mrb[22].mxu1  ;;  %857 = vmatprep.mubr.bf16.mxu0 %v586_v8 }
 0x219   :  { %v517_v13 = vpack.c.bf16 %v482_v11, %v478_v7  ;;  %v484_v14 = vpop.f32.mrb[23].mxu1  ;;  %858 = vmatmul.mubr.bf16.gmra.mrb[32].mxu0 %v585_v10 }
 0x21a   :  { %v518_v15 = vpack.c.bf16 %v484_v14, %v480_v9 }
 0x21b   :  { %v571_v16 = vadd.bf16 %v2020_v21, %v517_v13 }
 0x21c   :  { %v572_v17 = vadd.bf16 %v2023_v57, %v518_v15 }
 0x21d   :  { %v587_v22 = vmax.bf16 %v1832_v27, %v571_v16 }
 0x21e   :  { %v488_v18 = vpop.f32.mrb[24].mxu1  ;;  %v588_v19 = vmax.bf16 %v1832_v27, %v572_v17 }
 0x21f   :  { %v490_v20 = vpop.f32.mrb[25].mxu1 }
 0x220   :  { %v492_v23 = vpop.f32.mrb[26].mxu1  ;;  %867 = vmatprep.mubr.bf16.mxu0 %v588_v19 }
 0x221   :  { %v519_v24 = vpack.c.bf16 %v492_v23, %v488_v18  ;;  %v494_v25 = vpop.f32.mrb[27].mxu1  ;;  %868 = vmatmul.mubr.bf16.gmra.mrb[36].mxu0 %v587_v22 }
 0x222   :  { %v520_v26 = vpack.c.bf16 %v494_v25, %v490_v20 }
 0x223   :  { %v573_v28 = vadd.bf16 %v2020_v21, %v519_v24 }
 0x224   :  { %v574_v29 = vadd.bf16 %v2023_v57, %v520_v26 }
 0x225   :  { %v589_v33 = vmax.bf16 %v1832_v27, %v573_v28 }
 0x226   :  { %v498_v30 = vpop.f32.mrb[28].mxu1  ;;  %v590_v31 = vmax.bf16 %v1832_v27, %v574_v29 }
 0x227   :  { %v500_v32 = vpop.f32.mrb[29].mxu1 }
 0x228   :  { %v502_v34 = vpop.f32.mrb[30].mxu1  ;;  %877 = vmatprep.mubr.bf16.mxu0 %v590_v31 }
 0x229   :  { %v521_v35 = vpack.c.bf16 %v502_v34, %v498_v30  ;;  %v504_v36 = vpop.f32.mrb[31].mxu1  ;;  %878 = vmatmul.mubr.bf16.gmra.mrb[40].mxu0 %v589_v33 }
 0x22a   :  { %v522_v37 = vpack.c.bf16 %v504_v36, %v500_v32 }
 0x22b   :  { %v575_v38 = vadd.bf16 %v2020_v21, %v521_v35  ;;  %v1533_v21 = vld.sshfl [vmem:[%s2172_s6] sm:$0x11 pattern:$0x75316420] }
 0x22c   :  { %v576_v39 = vadd.bf16 %v2023_v57, %v522_v37  ;;  %v923_v46 = vcombine.high %v1533_v21, %v1533_v21  ;;  %v930_v57 = vrot.slane %v1533_v21, %v2015_v12 }
 0x22d   :  { %v591_v41 = vmax.bf16 %v1832_v27, %v575_v38 }
 0x22e   :  { %v592_v40 = vmax.bf16 %v1832_v27, %v576_v39  ;;  %v937_v47 = vrot.slane %v923_v46, %v2015_v12  ;;  %v939_v48 = vpack.i.b16 %v930_v57, %v930_v57 }
 0x230   :  { %887 = vmatprep.mubr.bf16.mxu0 %v592_v40  ;;  %v946_v49 = vpack.i.b16 %v937_v47, %v937_v47  ;;  %v2063_v52 = vrot.slane %v939_v48, %v1993_v60 }
 0x231   :  { %888 = vmatmul.mubr.bf16.gmra.mrb[44].mxu0 %v591_v41 }
 0x232   :  { %v2066_v54 = vrot.slane %v946_v49, %v1993_v60 }
 0x2cc   :  { %v819_v50 = vpop.f32.mrb[16].mxu0 }
 0x2cd   :  { %v821_v51 = vpop.f32.mrb[17].mxu0 }
 0x2ce   :  { %v823_v53 = vpop.f32.mrb[18].mxu0 }
 0x2cf   :  { %v898_v55 = vpack.c.bf16 %v823_v53, %v819_v50  ;;  %v825_v56 = vpop.f32.mrb[19].mxu0 }
 0x2d0   :  { %v899_v58 = vpack.c.bf16 %v825_v56, %v821_v51 }
 0x2d1   :  { %v952_v59 = vadd.bf16 %v2063_v52, %v898_v55 }
 0x2d2   :  { %v953_v61 = vadd.bf16 %v2066_v54, %v899_v58 }
 0x2d3   :  { %v968_v0 = vmax.bf16 %v1832_v27, %v952_v59 }
 0x2d4   :  { %v829_v62 = vpop.f32.mrb[20].mxu0  ;;  %v969_v63 = vmax.bf16 %v1832_v27, %v953_v61 }
 0x2d5   :  { %v831_v1 = vpop.f32.mrb[21].mxu0 }
 0x2d6   :  { %v833_v2 = vpop.f32.mrb[22].mxu0  ;;  %1208 = vmatprep.mubr.bf16.mxu1 %v969_v63 }
 0x2d7   :  { %v900_v3 = vpack.c.bf16 %v833_v2, %v829_v62  ;;  %v835_v4 = vpop.f32.mrb[23].mxu0  ;;  %1209 = vmatmul.mubr.bf16.vlgmr.msra.gmra.mrb[32].mxu1 %v968_v0 }
 0x2d8   :  { %v901_v5 = vpack.c.bf16 %v835_v4, %v831_v1 }
 0x2d9   :  { %v954_v6 = vadd.bf16 %v2063_v52, %v900_v3 }
 0x2da   :  { %v955_v7 = vadd.bf16 %v2066_v54, %v901_v5 }
 0x2db   :  { %v970_v11 = vmax.bf16 %v1832_v27, %v954_v6 }
 0x2dc   :  { %v839_v8 = vpop.f32.mrb[24].mxu0  ;;  %v971_v9 = vmax.bf16 %v1832_v27, %v955_v7 }
 0x2dd   :  { %v841_v10 = vpop.f32.mrb[25].mxu0 }
 0x2de   :  { %v843_v13 = vpop.f32.mrb[26].mxu0  ;;  %1218 = vmatprep.mubr.bf16.mxu1 %v971_v9 }
 0x2df   :  { %v902_v14 = vpack.c.bf16 %v843_v13, %v839_v8  ;;  %v845_v15 = vpop.f32.mrb[27].mxu0  ;;  %1219 = vmatmul.mubr.bf16.gmra.mrb[36].mxu1 %v970_v11  ;;  %v2103_v11 = vld.sshfl [vmem:[%s2175_s9] sm:$0x11 pattern:$0x75316420] }
 0x2e0   :  { %v903_v16 = vpack.c.bf16 %v845_v15, %v841_v10  ;;  %v1394_v13 = vcombine.high %v2103_v11, %v2103_v11 }
 0x2e1   :  { %v956_v17 = vadd.bf16 %v2063_v52, %v902_v14 }
 0x2e2   :  { %v957_v18 = vadd.bf16 %v2066_v54, %v903_v16  ;;  %v1408_v14 = vrot.slane %v1394_v13, %v2015_v12 }
 0x2e3   :  { %v972_v23 = vmax.bf16 %v1832_v27, %v956_v17 }
 0x2e4   :  { %v849_v19 = vpop.f32.mrb[28].mxu0  ;;  %v973_v20 = vmax.bf16 %v1832_v27, %v957_v18  ;;  %1443 = vmatprep.mubr.bf16.mxu0 %v1408_v14 }
 0x2e5   :  { %v851_v22 = vpop.f32.mrb[29].mxu0 }
 0x2e6   :  { %v853_v24 = vpop.f32.mrb[30].mxu0  ;;  %1228 = vmatprep.mubr.bf16.mxu1 %v973_v20 }
 0x2e7   :  { %v904_v25 = vpack.c.bf16 %v853_v24, %v849_v19  ;;  %v855_v26 = vpop.f32.mrb[31].mxu0  ;;  %1229 = vmatmul.mubr.bf16.gmra.mrb[40].mxu1 %v972_v23 }
 0x2e8   :  { %v905_v28 = vpack.c.bf16 %v855_v26, %v851_v22 }
 0x2e9   :  { %v958_v29 = vadd.bf16 %v2063_v52, %v904_v25 }
 0x2ea   :  { %v959_v30 = vadd.bf16 %v2066_v54, %v905_v28 }
 0x2eb   :  { %v974_v34 = vmax.bf16 %v1832_v27, %v958_v29 }
 0x2ec   :  { %v859_v31 = vpop.f32.mrb[32].mxu0  ;;  %v975_v32 = vmax.bf16 %v1832_v27, %v959_v30 }
 0x2ed   :  { %v861_v33 = vpop.f32.mrb[33].mxu0 }
 0x2ee   :  { %v863_v35 = vpop.f32.mrb[34].mxu0  ;;  %1238 = vmatprep.mubr.bf16.mxu1 %v975_v32 }
 0x2ef   :  { %v906_v36 = vpack.c.bf16 %v863_v35, %v859_v31  ;;  %v865_v37 = vpop.f32.mrb[35].mxu0  ;;  %1239 = vmatmul.mubr.bf16.gmra.mrb[44].mxu1 %v974_v34 }
 0x2f0   :  { %v907_v38 = vpack.c.bf16 %v865_v37, %v861_v33 }
 0x2f1   :  { %v960_v39 = vadd.bf16 %v2063_v52, %v906_v36 }
 0x2f2   :  { %v961_v40 = vadd.bf16 %v2066_v54, %v907_v38 }
 0x2f3   :  { %v976_v44 = vmax.bf16 %v1832_v27, %v960_v39 }
 0x2f4   :  { %v869_v41 = vpop.f32.mrb[36].mxu0  ;;  %v977_v42 = vmax.bf16 %v1832_v27, %v961_v40 }
 0x2f5   :  { %v871_v43 = vpop.f32.mrb[37].mxu0 }
 0x2f6   :  { %v873_v45 = vpop.f32.mrb[38].mxu0  ;;  %1248 = vmatprep.mubr.bf16.mxu1 %v977_v42 }
 0x2f7   :  { %v908_v21 = vpack.c.bf16 %v873_v45, %v869_v41  ;;  %v875_v46 = vpop.f32.mrb[39].mxu0  ;;  %1249 = vmatmul.mubr.bf16.gmra.mrb[48].mxu1 %v976_v44 }
 0x2f8   :  { %v909_v57 = vpack.c.bf16 %v875_v46, %v871_v43 }
 0x2f9   :  { %v962_v47 = vadd.bf16 %v2063_v52, %v908_v21 }
 0x2fa   :  { %v963_v48 = vadd.bf16 %v2066_v54, %v909_v57 }
 0x2fb   :  { %v978_v53 = vmax.bf16 %v1832_v27, %v962_v47 }
 0x2fc   :  { %v879_v49 = vpop.f32.mrb[40].mxu0  ;;  %v979_v50 = vmax.bf16 %v1832_v27, %v963_v48 }
 0x2fd   :  { %v881_v51 = vpop.f32.mrb[41].mxu0 }
 0x2fe   :  { %v883_v55 = vpop.f32.mrb[42].mxu0  ;;  %1258 = vmatprep.mubr.bf16.mxu1 %v979_v50 }
 0x2ff   :  { %v910_v56 = vpack.c.bf16 %v883_v55, %v879_v49  ;;  %v885_v58 = vpop.f32.mrb[43].mxu0  ;;  %1259 = vmatmul.mubr.bf16.gmra.mrb[52].mxu1 %v978_v53 }
 0x300   :  { %v911_v59 = vpack.c.bf16 %v885_v58, %v881_v51 }
 0x301   :  { %v964_v61 = vadd.bf16 %v2063_v52, %v910_v56 }
 0x302   :  { %v965_v62 = vadd.bf16 %v2066_v54, %v911_v59 }
 0x303   :  { %v980_v2 = vmax.bf16 %v1832_v27, %v964_v61 }
 0x304   :  { %v889_v63 = vpop.f32.mrb[44].mxu0  ;;  %v981_v0 = vmax.bf16 %v1832_v27, %v965_v62 }
 0x305   :  { %v891_v1 = vpop.f32.mrb[45].mxu0 }
 0x306   :  { %v893_v3 = vpop.f32.mrb[46].mxu0  ;;  %1268 = vmatprep.mubr.bf16.mxu1 %v981_v0 }
 0x307   :  { %v912_v4 = vpack.c.bf16 %v893_v3, %v889_v63  ;;  %v895_v5 = vpop.f32.mrb[47].mxu0  ;;  %1269 = vmatmul.mubr.bf16.gmra.mrb[56].mxu1 %v980_v2 }
 0x308   :  { %v913_v6 = vpack.c.bf16 %v895_v5, %v891_v1 }
 0x309   :  { %v966_v7 = vadd.bf16 %v2063_v52, %v912_v4  ;;  %v1376_v52 = vld [vmem:[#allocation2] sm:$0x1] }
 0x30a   :  { %v967_v8 = vadd.bf16 %v2066_v54, %v913_v6  ;;  %1379 = vperm.xlu0 %1604, %v1376_v52   ;;  %v1566_v54 = vld.sshfl [vmem:[%s2174_s8] sm:$0x11 pattern:$0x75316420]  ;;  %s1834_s8 = smov [#allocation9]  }
 0x30b   :  { %v982_v10 = vmax.bf16 %v1832_v27, %v966_v7  ;;  %v1314_v15 = vcombine.high %v1566_v54, %v1566_v54  ;;  %v1321_v16 = vrot.slane %v1566_v54, %v2015_v12  ;;  %s1458_s9 = sshll.u32 %s1834_s8, 4  ;;  %s1459_s9 = int_to_ptr.vmem [resolvable:$true] %s1458_s9 }
 0x30c   :  { %v983_v9 = vmax.bf16 %v1832_v27, %v967_v8  ;;  %s1799_s17 = scalar_lea.vmem %s1459_s9, 16  ;;  %s1803_s18 = scalar_lea.vmem %s1459_s9, 32 }
 0x30d   :  { %v1328_v17 = vrot.slane %v1314_v15, %v2015_v12  ;;  %v1330_v18 = vpack.i.b16 %v1321_v16, %v1321_v16  ;;  %p1800_p10 = scmp.ne.s32.totalorder %s1459_s9, %s1799_s17  ;;  %p1804_p11 = scmp.lt.s32.totalorder %s1459_s9, %s1459_s9 }
 0x30e   :  { %1278 = vmatprep.mubr.bf16.mxu1 %v983_v9  ;;  %p1805_p12 = scmp.lt.s32.totalorder %s1803_s18, %s1799_s17 }
 0x30f   :  { %1279 = vmatmul.mubr.bf16.gmra.mrb[60].mxu1 %v982_v10  ;;  %v1337_v19 = vpack.i.b16 %v1328_v17, %v1328_v17  ;;  %v2114_v23 = vrot.slane %v1330_v18, %v1993_v60 }
 0x310   :  { %p1806_p13 = por %p1805_p12, %p1804_p11 }
 0x311   :  { %v2117_v25 = vrot.slane %v1337_v19, %v1993_v60 }
 0x312   :  { %p1807_p0 = pnand %p1806_p13, %p1800_p10 }
 0x3aa   :  { %v1210_v20 = vpop.f32.mrb[32].mxu1 }
 0x3ab   :  { %v1212_v22 = vpop.f32.mrb[33].mxu1 }
 0x3ac   :  { %v1214_v24 = vpop.f32.mrb[34].mxu1 }
 0x3ad   :  { %v1289_v26 = vpack.c.bf16 %v1214_v24, %v1210_v20  ;;  %v1216_v28 = vpop.f32.mrb[35].mxu1 }
 0x3ae   :  { %v1290_v29 = vpack.c.bf16 %v1216_v28, %v1212_v22 }
 0x3af   :  { %v1343_v30 = vadd.bf16 %v2114_v23, %v1289_v26 }
 0x3b0   :  { %v1344_v31 = vadd.bf16 %v2117_v25, %v1290_v29 }
 0x3b1   :  { %v1359_v34 = vmax.bf16 %v1832_v27, %v1343_v30 }
 0x3b2   :  { %v1220_v32 = vpop.f32.mrb[36].mxu1  ;;  %v1360_v33 = vmax.bf16 %v1832_v27, %v1344_v31 }
 0x3b3   :  { %v1222_v35 = vpop.f32.mrb[37].mxu1 }
 0x3b4   :  { %v1224_v36 = vpop.f32.mrb[38].mxu1  ;;  %1411 = vmatprep.subr.bf16.mxu0 %v1360_v33 }
 0x3b5   :  { %v1291_v37 = vpack.c.bf16 %v1224_v36, %v1220_v32  ;;  %v1226_v38 = vpop.f32.mrb[39].mxu1  ;;  %1412 = vmatpush1.bf16.xpose.msra.mxu0 %v1359_v34 }
 0x3b6   :  { %v1292_v39 = vpack.c.bf16 %v1226_v38, %v1222_v35 }
 0x3b7   :  { %v1345_v40 = vadd.bf16 %v2114_v23, %v1291_v37 }
 0x3b8   :  { %v1346_v41 = vadd.bf16 %v2117_v25, %v1292_v39 }
 0x3b9   :  { %v1361_v44 = vmax.bf16 %v1832_v27, %v1345_v40 }
 0x3ba   :  { %v1230_v42 = vpop.f32.mrb[40].mxu1  ;;  %v1362_v43 = vmax.bf16 %v1832_v27, %v1346_v41 }
 0x3bb   :  { %v1232_v45 = vpop.f32.mrb[41].mxu1 }
 0x3bc   :  { %v1234_v21 = vpop.f32.mrb[42].mxu1  ;;  %1413 = vmatprep.subr.bf16.mxu0 %v1362_v43 }
 0x3bd   :  { %v1293_v46 = vpack.c.bf16 %v1234_v21, %v1230_v42  ;;  %v1236_v57 = vpop.f32.mrb[43].mxu1  ;;  %1414 = vmatpush1.bf16.xpose.msra.mxu0 %v1361_v44  ;;  %v1401_v21 = vrot.slane %v2103_v11, %v2015_v12 }
 0x3be   :  { %v1294_v47 = vpack.c.bf16 %v1236_v57, %v1232_v45 }
 0x3bf   :  { %v1347_v48 = vadd.bf16 %v2114_v23, %v1293_v46  ;;  %v1380_v46 = vpop.permute.xlu0 %1379 }
 0x3c0   :  { %v1348_v49 = vadd.bf16 %v2117_v25, %v1294_v47  ;;  %v1385_v57 = vrot.slane %v1380_v46, %v1993_v60 }
 0x3c1   :  { %v1363_v53 = vmax.bf16 %v1832_v27, %v1347_v48 }
 0x3c2   :  { %v1240_v50 = vpop.f32.mrb[44].mxu1  ;;  %v1364_v51 = vmax.bf16 %v1832_v27, %v1348_v49 }
 0x3c3   :  { %v1242_v55 = vpop.f32.mrb[45].mxu1 }
 0x3c4   :  { %v1244_v56 = vpop.f32.mrb[46].mxu1  ;;  %1415 = vmatprep.subr.bf16.mxu0 %v1364_v51 }
 0x3c5   :  { %v1295_v58 = vpack.c.bf16 %v1244_v56, %v1240_v50  ;;  %v1246_v59 = vpop.f32.mrb[47].mxu1  ;;  %1416 = vmatpush1.bf16.xpose.msra.mxu0 %v1363_v53 }
 0x3c6   :  { %v1296_v61 = vpack.c.bf16 %v1246_v59, %v1242_v55 }
 0x3c7   :  { %v1349_v62 = vadd.bf16 %v2114_v23, %v1295_v58 }
 0x3c8   :  { %v1350_v63 = vadd.bf16 %v2117_v25, %v1296_v61 }
 0x3c9   :  { %v1365_v2 = vmax.bf16 %v1832_v27, %v1349_v62 }
 0x3ca   :  { %v1250_v0 = vpop.f32.mrb[48].mxu1  ;;  %v1366_v1 = vmax.bf16 %v1832_v27, %v1350_v63 }
 0x3cb   :  { %v1252_v3 = vpop.f32.mrb[49].mxu1 }
 0x3cc   :  { %v1254_v4 = vpop.f32.mrb[50].mxu1  ;;  %1417 = vmatprep.subr.bf16.mxu0 %v1366_v1 }
 0x3cd   :  { %v1297_v5 = vpack.c.bf16 %v1254_v4, %v1250_v0  ;;  %v1256_v6 = vpop.f32.mrb[51].mxu1  ;;  %1418 = vmatpush1.bf16.xpose.msra.mxu0 %v1365_v2 }
 0x3ce   :  { %v1298_v7 = vpack.c.bf16 %v1256_v6, %v1252_v3 }
 0x3cf   :  { %v1351_v8 = vadd.bf16 %v2114_v23, %v1297_v5 }
 0x3d0   :  { %v1352_v9 = vadd.bf16 %v2117_v25, %v1298_v7 }
 0x3d1   :  { %v1367_v14 = vmax.bf16 %v1832_v27, %v1351_v8 }
 0x3d2   :  { %v1260_v10 = vpop.f32.mrb[52].mxu1  ;;  %v1368_v13 = vmax.bf16 %v1832_v27, %v1352_v9 }
 0x3d3   :  { %v1262_v52 = vpop.f32.mrb[53].mxu1 }
 0x3d4   :  { %v1264_v54 = vpop.f32.mrb[54].mxu1  ;;  %1419 = vmatprep.subr.bf16.mxu0 %v1368_v13 }
 0x3d5   :  { %v1299_v15 = vpack.c.bf16 %v1264_v54, %v1260_v10  ;;  %v1266_v16 = vpop.f32.mrb[55].mxu1  ;;  %1420 = vmatpush1.bf16.xpose.msra.mxu0 %v1367_v14 }
 0x3d6   :  { %v1300_v17 = vpack.c.bf16 %v1266_v16, %v1262_v52 }
 0x3d7   :  { %v1353_v18 = vadd.bf16 %v2114_v23, %v1299_v15 }
 0x3d8   :  { %v1354_v19 = vadd.bf16 %v2117_v25, %v1300_v17 }
 0x3d9   :  { %v1369_v24 = vmax.bf16 %v1832_v27, %v1353_v18 }
 0x3da   :  { %v1270_v20 = vpop.f32.mrb[56].mxu1  ;;  %v1370_v22 = vmax.bf16 %v1832_v27, %v1354_v19 }
 0x3db   :  { %v1272_v26 = vpop.f32.mrb[57].mxu1 }
 0x3dc   :  { %v1274_v28 = vpop.f32.mrb[58].mxu1  ;;  %1421 = vmatprep.subr.bf16.mxu0 %v1370_v22 }
 0x3dd   :  { %v1301_v29 = vpack.c.bf16 %v1274_v28, %v1270_v20  ;;  %v1276_v30 = vpop.f32.mrb[59].mxu1  ;;  %1422 = vmatpush1.bf16.xpose.msra.mxu0 %v1369_v24 }
 0x3de   :  { %v1302_v31 = vpack.c.bf16 %v1276_v30, %v1272_v26 }
 0x3df   :  { %v1355_v32 = vadd.bf16 %v2114_v23, %v1301_v29 }
 0x3e0   :  { %v1356_v33 = vadd.bf16 %v2117_v25, %v1302_v31 }
 0x3e1   :  { %v1371_v36 = vmax.bf16 %v1832_v27, %v1355_v32 }
 0x3e2   :  { %v1280_v34 = vpop.f32.mrb[60].mxu1  ;;  %v1372_v35 = vmax.bf16 %v1832_v27, %v1356_v33 }
 0x3e3   :  { %v1282_v37 = vpop.f32.mrb[61].mxu1 }
 0x3e4   :  { %v1284_v38 = vpop.f32.mrb[62].mxu1  ;;  %1423 = vmatprep.subr.bf16.mxu0 %v1372_v35 }
 0x3e5   :  { %v1303_v39 = vpack.c.bf16 %v1284_v38, %v1280_v34  ;;  %v1286_v40 = vpop.f32.mrb[63].mxu1  ;;  %1424 = vmatpush1.bf16.xpose.msra.mxu0 %v1371_v36 }
 0x3e6   :  { %v1304_v41 = vpack.c.bf16 %v1286_v40, %v1282_v37 }
 0x3e7   :  { %v1357_v42 = vadd.bf16 %v2114_v23, %v1303_v39 }
 0x3e8   :  { %v1358_v43 = vadd.bf16 %v2117_v25, %v1304_v41 }
 0x3e9   :  { %v1373_v45 = vmax.bf16 %v1832_v27, %v1357_v42 }
 0x3ea   :  { %v1374_v44 = vmax.bf16 %v1832_v27, %v1358_v43 }
 0x3ec   :  { %1425 = vmatprep.subr.bf16.mxu0 %v1374_v44 }
 0x3ed   :  { %1426 = vmatpush1.bf16.xpose.msra.mxu0 %v1373_v45 }
 0x3f4   :  { %1444 = vmatmul.mubr.bf16.vlgmr.msra.gmra.mrb[48].mxu0 %v1401_v21 }
 0x4c7   :  { %v1445_v47 = vpop.f32.mrb[48].mxu0 }
 0x4c8   :  { %v1446_v48 = vadd.f32 %v1445_v47, %v1385_v57  ;;  %v1447_v23 = vpop.f32.mrb[49].mxu0 }
 0x4c9   :  { %v1448_v25 = vpop.f32.mrb[50].mxu0 }
 0x4ca   :  { %1451 = vst [vmem:[#allocation9] sm:$0x1] %v1446_v48  ;;  %v1449_v49 = vpop.f32.mrb[51].mxu0 }
 0x4cb   :  { %1810 = shalt.err (!%p1807_p0)
}
 0x4cc   :  { %s1811_s23 = scalar_lea.hbm %s2177_s11, 16 }
 0x4cd   :  { %p1812_p1 = scmp.ne.s32.totalorder %s2177_s11, %s1811_s23  ;;  %p1815_p2 = scmp.lt.u32.totalorder %s1811_s23, %s2177_s11 }
 0x4cf   :  { %p1817_p3 = pnand %p1815_p2, %p1812_p1 }
 0x4d1   :  { %1820 = shalt.err (!%p1817_p3)
}
 0x4d2   :  { %1461 = dma.vmem_to_hbm [thread:$0]  %s1459_s9, 16, %s2177_s11, [#allocation5]  }
 0x4d3   :  { %1825 = dma.done.wait [#allocation5], 16  }
 0x4d4   :  { %1826 = vsyncadd [#allocation5], 4294967280 }
 0x4d5   :  { %1465 = vsyncpa [#allocation4], 1 }
 0x4d6   :  { %1466 = vsyncpa [#allocation7], 1 }
 0x4d7   :  { %1467 = vsyncpa [#allocation5], 1 }

</bundles_post_ra>
